<compile_context>
chip_gen: v5e
topology: v5e:2x2
jax: 0.10.0
libtpu: 0.0.40
codegen_flags: <defaults>
</compile_context>

<pallas_src>
import functools

import jax
import jax.numpy as jnp
from jax import lax
from jax.experimental import pallas as pl
from jax.experimental.pallas import tpu as pltpu


def _conv_im2col_kernel(x_ref, w_ref, o_ref):
    # x_ref: (N, Kp, HW)    im2col'd + bias-augmented input (HW on the lane axis)
    # w_ref: (Cout, Kp)     flattened conv weights with bias column folded in
    # o_ref: (N, Cout, HW)  lane-dense output
    w = w_ref[...]
    for n in range(x_ref.shape[0]):            # N is tiny (2): static unroll
        acc = lax.dot_general(
            w, x_ref[n],
            dimension_numbers=(((1,), (0,)), ((), ())),
            preferred_element_type=jnp.float32)            # (Cout, HW)
        o_ref[n] = acc.astype(o_ref.dtype)


@functools.partial(jax.jit, static_argnames=("padding",))
def network_signal_forward(x_nchw, weight_oihw, bias, *, padding):
    """Forward of NetworkSignal: Conv2d(kernel_size, padding, padding_mode='replicate')."""
    N, Cin, H, W = x_nchw.shape
    Cout, _, KH, KW = weight_oihw.shape
    HW = H * W
    K = Cin * KH * KW
    Kp = ((K + 1 + 7) // 8) * 8          # + bias row, rounded to sublane multiple
    dtype = x_nchw.dtype

    # --- glue (fused by jit / allow_input_fusion): replicate pad + im2col ---
    x_pad = jnp.pad(
        x_nchw,
        ((0, 0), (0, 0), (padding, padding), (padding, padding)),
        mode="edge")                                          # (N, Cin, Hp, Wp)
    cols = jnp.stack(
        [x_pad[:, :, kh:kh + H, kw:kw + W]
         for kh in range(KH) for kw in range(KW)],
        axis=2)                                               # (N, Cin, KH*KW, H, W)
    x_col = cols.reshape(N, K, HW)                            # K order = (cin, kh, kw)
    x_aug = jnp.concatenate(
        [x_col,
         jnp.ones((N, 1, HW), dtype),                         # bias row
         jnp.zeros((N, Kp - K - 1, HW), dtype)],              # sublane alignment pad
        axis=1)                                               # (N, Kp, HW)

    w_flat = weight_oihw.reshape(Cout, K).astype(dtype)       # matches (cin, kh, kw) order
    b = jnp.zeros((Cout,), dtype) if bias is None else bias.astype(dtype)
    w_aug = jnp.concatenate(
        [w_flat, b[:, None], jnp.zeros((Cout, Kp - K - 1), dtype)],
        axis=1)                                               # (Cout, Kp)

    out_flat = pl.pallas_call(
        _conv_im2col_kernel,
        out_shape=jax.ShapeDtypeStruct((N, Cout, HW), dtype),
        grid=(1,),                                            # single step: nothing to pipeline
        in_specs=[
            pl.BlockSpec((N, Kp, HW), lambda i: (0, 0, 0)),
            pl.BlockSpec((Cout, Kp), lambda i: (0, 0)),
        ],
        out_specs=pl.BlockSpec((N, Cout, HW), lambda i: (0, 0, 0)),
        compiler_params=pltpu.CompilerParams(
            allow_input_fusion=[True, False]),                # let XLA fuse the im2col producer
    )(x_aug, w_aug)

    # Free reshape back to NCHW (no transpose needed).
    return out_flat.reshape(N, Cout, H, W)


def _reference_forward(x_nchw, weight_oihw, bias, padding):
    # Pure-JAX reference (replicate padding + VALID conv) for verification.
    x_pad = jnp.pad(
        x_nchw,
        ((0, 0), (0, 0), (padding, padding), (padding, padding)),
        mode="edge")
    out = lax.conv_general_dilated(
        x_pad, weight_oihw, window_strides=(1, 1), padding="VALID",
        dimension_numbers=("NCHW", "OIHW", "NCHW"))
    if bias is not None:
        out = out + bias[None, :, None, None]
    return out


if __name__ == "__main__":
    # NetworkSignal(input_nc=4, output_nc=8, kernel_size=3, padding=1, use_bias=True)
    input_nc, output_nc, kernel_size, padding, use_bias = 4, 8, 3, 1, True
    N, H, W = 2, 16, 16

    key = jax.random.PRNGKey(0)
    kx, kw, kb = jax.random.split(key, 3)
    x = jax.random.normal(kx, (N, input_nc, H, W), dtype=jnp.float32)
    weight = 0.1 * jax.random.normal(
        kw, (output_nc, input_nc, kernel_size, kernel_size), dtype=jnp.float32)
    bias = 0.1 * jax.random.normal(kb, (output_nc,), dtype=jnp.float32) if use_bias else None

    out = network_signal_forward(x, weight, bias, padding=padding)
    out = jax.block_until_ready(out)

    ref = _reference_forward(x, weight, bias, padding)
    assert out.shape == (N, output_nc, H, W)
    assert jnp.allclose(out, ref, atol=1e-4, rtol=1e-4)

    print("KERNEL_OK")
</pallas_src>

<mosaic_0001>
module attributes {stable_mosaic.version = 11 : i64} {
  func.func @_conv_im2col_kernel(%arg0: i32, %arg1: memref<2x40x256xf32, #tpu.memory_space<vmem>>, %arg2: memref<8x40xf32, #tpu.memory_space<vmem>>, %arg3: memref<2x8x256xf32, #tpu.memory_space<vmem>>) attributes {dimension_semantics = [#tpu.dimension_semantics<arbitrary>], iteration_bounds = array<i64: 1>, scalar_prefetch = 0 : i64, scratch_operands = 0 : i64, tpu.core_type = #tpu.core_type<tc>, window_params = [{pipeline_mode = #tpu.pipeline_mode<synchronous>, transform_indices = @transform_0, window_bounds = array<i64: 2, 40, 256>}, {pipeline_mode = #tpu.pipeline_mode<synchronous>, transform_indices = @transform_1, window_bounds = array<i64: 8, 40>}, {pipeline_mode = #tpu.pipeline_mode<synchronous>, transform_indices = @transform_2, window_bounds = array<i64: 2, 8, 256>}]} {
    %c0 = arith.constant 0 : index
    %c0_0 = arith.constant 0 : index
    %0 = vector.load %arg2[%c0, %c0_0] : memref<8x40xf32, #tpu.memory_space<vmem>>, vector<8x40xf32>
    %c0_1 = arith.constant 0 : index
    %c0_2 = arith.constant 0 : index
    %c0_3 = arith.constant 0 : index
    %1 = vector.load %arg1[%c0_1, %c0_2, %c0_3] : memref<2x40x256xf32, #tpu.memory_space<vmem>>, vector<1x40x256xf32>
    %2 = vector.shape_cast %1 : vector<1x40x256xf32> to vector<40x256xf32>
    %cst = arith.constant dense<0.000000e+00> : vector<8x256xf32>
    %3 = tpu.matmul %0, %2, %cst {dimension_numbers = #tpu.dot_dimension_numbers<[1], [0], [0], [1], [0, 0, 1, 1], [], []>} : vector<8x40xf32>, vector<40x256xf32>, vector<8x256xf32> -> vector<8x256xf32>
    %c0_4 = arith.constant 0 : index
    %c0_5 = arith.constant 0 : index
    %c0_6 = arith.constant 0 : index
    %4 = vector.load %arg3[%c0_4, %c0_5, %c0_6] : memref<2x8x256xf32, #tpu.memory_space<vmem>>, vector<1x8x256xf32>
    %5 = vector.shape_cast %4 : vector<1x8x256xf32> to vector<8x256xf32>
    %6 = vector.shape_cast %3 : vector<8x256xf32> to vector<1x8x256xf32>
    tpu.vector_store %arg3[%c0_4, %c0_5, %c0_6], %6 {strides = array<i32>} : memref<2x8x256xf32, #tpu.memory_space<vmem>>, vector<1x8x256xf32>,
    %c1 = arith.constant 1 : index
    %c0_7 = arith.constant 0 : index
    %c0_8 = arith.constant 0 : index
    %7 = vector.load %arg1[%c1, %c0_7, %c0_8] : memref<2x40x256xf32, #tpu.memory_space<vmem>>, vector<1x40x256xf32>
    %8 = vector.shape_cast %7 : vector<1x40x256xf32> to vector<40x256xf32>
    %cst_9 = arith.constant dense<0.000000e+00> : vector<8x256xf32>
    %9 = tpu.matmul %0, %8, %cst_9 {dimension_numbers = #tpu.dot_dimension_numbers<[1], [0], [0], [1], [0, 0, 1, 1], [], []>} : vector<8x40xf32>, vector<40x256xf32>, vector<8x256xf32> -> vector<8x256xf32>
    %c1_10 = arith.constant 1 : index
    %c0_11 = arith.constant 0 : index
    %c0_12 = arith.constant 0 : index
    %10 = vector.load %arg3[%c1_10, %c0_11, %c0_12] : memref<2x8x256xf32, #tpu.memory_space<vmem>>, vector<1x8x256xf32>
    %11 = vector.shape_cast %10 : vector<1x8x256xf32> to vector<8x256xf32>
    %12 = vector.shape_cast %9 : vector<8x256xf32> to vector<1x8x256xf32>
    tpu.vector_store %arg3[%c1_10, %c0_11, %c0_12], %12 {strides = array<i32>} : memref<2x8x256xf32, #tpu.memory_space<vmem>>, vector<1x8x256xf32>,
    return
  }
  func.func @transform_0(%arg0: i32) -> (i32, i32, i32) {
    %c0_i32 = arith.constant 0 : i32
    %c0_i32_0 = arith.constant 0 : i32
    %c0_i32_1 = arith.constant 0 : i32
    %c0_i32_2 = arith.constant 0 : i32
    return %c0_i32, %c0_i32_0, %c0_i32_1 : i32, i32, i32
  }
  func.func @transform_1(%arg0: i32) -> (i32, i32) {
    %c0_i32 = arith.constant 0 : i32
    %c0_i32_0 = arith.constant 0 : i32
    %c0_i32_1 = arith.constant 0 : i32
    return %c0_i32, %c0_i32_0 : i32, i32
  }
  func.func @transform_2(%arg0: i32) -> (i32, i32, i32) {
    %c0_i32 = arith.constant 0 : i32
    %c0_i32_0 = arith.constant 0 : i32
    %c0_i32_1 = arith.constant 0 : i32
    %c0_i32_2 = arith.constant 0 : i32
    return %c0_i32, %c0_i32_0, %c0_i32_1 : i32, i32, i32
  }
}

</mosaic_0001>

<bundles_post_ra>
// kernel: network_signal_forward.2
= control target key start
LH: loop header
LB: loop body
LE: loop exit
PB: predicated region body
PF: predicated region fallthrough
CT: control target
= control target key end

     0   :  { %v26_v1 = vlaneseq  ;;  %vm478_vm1 = vcmask 326656   ;;  %s752_s0 = inlined_call_operand.vmem [shape: f32[8,40], index: 0, kind: input, shape index: {}]   ;;  %s753_s1 = inlined_call_operand.vmem [shape: f32[2,36,256], index: 1, kind: input, shape index: {}]   ;;  %s754_s2 = inlined_call_operand.<no memory space> [shape: f32[], index: 2, kind: input, shape index: {}]   ;;  %s755_s3 = inlined_call_operand.vmem [shape: f32[40], index: 3, kind: input, shape index: {}]   ;;  %s756_s4 = inlined_call_operand.vmem [shape: f32[40], index: 4, kind: input, shape index: {}]   ;;  %s757_s5 = inlined_call_operand.vmem [shape: f32[2,8,256], index: 5, kind: output, shape index: {}]  }
   0x1   :  { %v10_v0 = vstv %s754_s2  ;;  %v232_v5 = vld [vmem:[%s755_s3] ss:$0 sm:$0xff]  ;;  %v590_v11 = vld [vmem:[%s753_s1 + $0x48] sm:$0xff]  ;;  %v599_v12 = vld [vmem:[%s753_s1 + $0x90] sm:$0xff] }
   0x2   :  { %v27_v2 = vshrl.u32 %v26_v1, 7  ;;  %v239_v6 = vld [vmem:[%s756_s4] ss:$0 sm:$0xff]  ;;  %v600_v13 = vld [vmem:[%s753_s1 + $0x98] sm:$0xff]  ;;  %v587_v33 = vld [vmem:[%s753_s1 + $0x30] sm:$0xff] }
   0x3   :  { %v608_v7 = vpack.i.bf16 %v232_v5, %v239_v6  ;;  %v589_v10 = vld [vmem:[%s753_s1 + $0x40] sm:$0xff]  ;;  %v586_v34 = vld [vmem:[%s753_s1 + $0x28] sm:$0xff]  ;;  %v595_v35 = vld [vmem:[%s753_s1 + $0x70] sm:$0xff] }
   0x4   :  { %v229_v3 = vadd.s32 32, %v27_v2  ;;  %v131_v4 = vadd.s32 16, %v27_v2  ;;  %631 = vset.pattern.permute.xlu2 %v27_v2  ;;  %v183_v8 = vadd.s32 24, %v27_v2  ;;  %v79_v9 = vadd.s32 8, %v27_v2  ;;  %v585_v32 = vld [vmem:[%s753_s1 + $0x20] sm:$0xff]  ;;  %v588_v38 = vld [vmem:[%s753_s1 + $0x38] sm:$0xff] }
   0x5   :  { %v597_v39 = vld [vmem:[%s753_s1 + $0x80] sm:$0xff]  ;;  %v598_v40 = vld [vmem:[%s753_s1 + $0x88] sm:$0xff]  ;;  %v596_v45 = vld [vmem:[%s753_s1 + $0x78] sm:$0xff] }
   0x6   :  { %607 = vset.pattern.permute.xlu0 %v229_v3  ;;  %619 = vset.pattern.permute.xlu1 %v131_v4  ;;  %vm230_vm0 = vcmp.lt.s32.totalorder %v229_v3, 36  ;;  %v583_v46 = vld [vmem:[%s753_s1 + $0x10] sm:$0xff]  ;;  %v584_v47 = vld [vmem:[%s753_s1 + $0x18] sm:$0xff]  ;;  %v593_v52 = vld [vmem:[%s753_s1 + $0x60] sm:$0xff] }
   0x7   :  { %v231_v15 = vsel %vm230_vm0, %v589_v10, %v10_v0  ;;  %v264_v16 = vsel %vm230_vm0, %v590_v11, %v10_v0  ;;  %v435_v17 = vsel %vm230_vm0, %v599_v12, %v10_v0  ;;  %v454_v18 = vsel %vm230_vm0, %v600_v13, %v10_v0  ;;  %v594_v57 = vld [vmem:[%s753_s1 + $0x68] sm:$0xff]  ;;  %v19_v58 = vld [vmem:[%s753_s1] sm:$0xff]  ;;  %v591_v0 = vld [vmem:[%s753_s1 + $0x50] sm:$0xff] }
   0x8   :  { %v582_v59 = vld [vmem:[%s753_s1 + $0x8] sm:$0xff]  ;;  %v592_v5 = vld [vmem:[%s753_s1 + $0x58] sm:$0xff] }
   0xc   :  { %633 = vperm.xlu2 %631, %v608_v7  }
   0xe   :  { %609 = vperm.xlu0 %607, %v608_v7   ;;  %621 = vperm.xlu1 %619, %v608_v7  }
  0x16   :  { %613 = vset.pattern.permute.xlu0 %v183_v8  ;;  %625 = vset.pattern.permute.xlu1 %v79_v9 }
  0x1e   :  { %615 = vperm.xlu0 %613, %v608_v7   ;;  %627 = vperm.xlu1 %625, %v608_v7  }
  0x26   :  { %637 = vset.pattern.permute.xlu0 %v229_v3 }
  0x66   :  { %v634_v31 = vpop.permute.xlu2 %633 }
  0x67   :  { %v635_v44 = vunpack.i.l.bf16 %v634_v31  ;;  %v636_v10 = vunpack.i.h.bf16 %v634_v31 }
  0x69   :  { %v41_v8 = vmax.f32 %v19_v58, %v635_v44  ;;  %v59_v9 = vmax.f32 %v582_v59, %v635_v44  ;;  %v286_v13 = vmax.f32 %v591_v0, %v635_v44 }
  0x80   :  { %v610_v14 = vpop.permute.xlu0 %609  ;;  %v622_v29 = vpop.permute.xlu1 %621 }
  0x81   :  { %v611_v19 = vunpack.i.l.bf16 %v610_v14  ;;  %v612_v20 = vunpack.i.h.bf16 %v610_v14  ;;  %v623_v30 = vunpack.i.l.bf16 %v622_v29  ;;  %v624_v41 = vunpack.i.h.bf16 %v622_v29 }
  0x83   :  { %v248_v21 = vmax.f32 %v231_v15, %v611_v19  ;;  %v267_v22 = vmax.f32 %v264_v16, %v611_v19  ;;  %v438_v23 = vmax.f32 %v435_v17, %v611_v19  ;;  %v457_v24 = vmax.f32 %v454_v18, %v611_v19 }
  0x84   :  { %v144_v49 = vmax.f32 %v585_v32, %v623_v30  ;;  %v163_v50 = vmax.f32 %v586_v34, %v623_v30  ;;  %v362_v51 = vmax.f32 %v595_v35, %v623_v30  ;;  %v381_v61 = vmax.f32 %v596_v45, %v623_v30 }
  0x85   :  { %v252_v25 = vmax.f32 %v248_v21, %v612_v20  ;;  %v271_v26 = vmax.f32 %v267_v22, %v612_v20  ;;  %v442_v27 = vmax.f32 %v438_v23, %v612_v20  ;;  %v461_v28 = vmax.f32 %v457_v24, %v612_v20 }
  0x86   :  { %v148_v11 = vmax.f32 %v144_v49, %v624_v41  ;;  %v167_v12 = vmax.f32 %v163_v50, %v624_v41  ;;  %v366_v14 = vmax.f32 %v362_v51, %v624_v41  ;;  %v385_v15 = vmax.f32 %v381_v61, %v624_v41 }
  0x87   :  { %493 = vmatpush.msra.mxu0 %v252_v25  ;;  %513 = vmatpush.msra.mxu1 %v271_v26  ;;  %v305_v16 = vmax.f32 %v592_v5, %v635_v44  ;;  %v45_v21 = vmax.f32 %v41_v8, %v636_v10  ;;  %v63_v22 = vmax.f32 %v59_v9, %v636_v10  ;;  %v467_v25 = vld [vmem:[%s752_s0] sm:$0xff] }
  0x88   :  { %546 = vmatpush.msra.mxu2 %v442_v27  ;;  %566 = vmatpush.msra.mxu3 %v461_v28  ;;  %v290_v23 = vmax.f32 %v286_v13, %v636_v10 }
  0x89   :  { %v309_v24 = vmax.f32 %v305_v16, %v636_v10 }
  0x90   :  { %v616_v36 = vpop.permute.xlu0 %615  ;;  %v628_v37 = vpop.permute.xlu1 %627 }
  0x91   :  { %v617_v42 = vunpack.i.l.bf16 %v616_v36  ;;  %v629_v43 = vunpack.i.l.bf16 %v628_v37  ;;  %v618_v48 = vunpack.i.h.bf16 %v616_v36  ;;  %v630_v60 = vunpack.i.h.bf16 %v628_v37 }
  0x93   :  { %v196_v53 = vmax.f32 %v587_v33, %v617_v42  ;;  %v215_v54 = vmax.f32 %v588_v38, %v617_v42  ;;  %v400_v55 = vmax.f32 %v597_v39, %v617_v42  ;;  %v419_v56 = vmax.f32 %v598_v40, %v617_v42 }
  0x94   :  { %v92_v62 = vmax.f32 %v583_v46, %v629_v43  ;;  %v111_v63 = vmax.f32 %v584_v47, %v629_v43  ;;  %v324_v6 = vmax.f32 %v593_v52, %v629_v43  ;;  %v343_v7 = vmax.f32 %v594_v57, %v629_v43 }
  0x95   :  { %v200_v1 = vmax.f32 %v196_v53, %v618_v48  ;;  %v219_v2 = vmax.f32 %v215_v54, %v618_v48  ;;  %v404_v3 = vmax.f32 %v400_v55, %v618_v48  ;;  %v423_v4 = vmax.f32 %v419_v56, %v618_v48 }
  0x96   :  { %v96_v17 = vmax.f32 %v92_v62, %v630_v60  ;;  %v115_v18 = vmax.f32 %v111_v63, %v630_v60  ;;  %v328_v19 = vmax.f32 %v324_v6, %v630_v60  ;;  %v347_v20 = vmax.f32 %v343_v7, %v630_v60 }
  0x97   :  { %494 = vmatpush.msra.mxu0 %v200_v1  ;;  %514 = vmatpush.msra.mxu1 %v219_v2 }
  0x98   :  { %547 = vmatpush.msra.mxu2 %v404_v3  ;;  %567 = vmatpush.msra.mxu3 %v423_v4 }
  0x99   :  { %495 = vmatpush.msra.mxu0 %v148_v11  ;;  %515 = vmatpush.msra.mxu1 %v167_v12 }
  0x9a   :  { %548 = vmatpush.msra.mxu2 %v366_v14  ;;  %568 = vmatpush.msra.mxu3 %v385_v15 }
  0x9b   :  { %496 = vmatpush.msra.mxu0 %v96_v17  ;;  %516 = vmatpush.msra.mxu1 %v115_v18 }
  0x9c   :  { %549 = vmatpush.msra.mxu2 %v328_v19  ;;  %569 = vmatpush.msra.mxu3 %v347_v20 }
  0x9d   :  { %497 = vmatpush.msra.mxu0 %v45_v21  ;;  %517 = vmatpush.msra.mxu1 %v63_v22 }
  0x9e   :  { %550 = vmatpush.msra.mxu2 %v290_v23  ;;  %570 = vmatpush.msra.mxu3 %v309_v24 }
  0x9f   :  { %603 = vmatmul.msk.f32.vlgmr.msra.gmra.mxu2 %vm478_vm1, %v467_v25  ;;  %604 = vmatmul.msk.f32.vlgmr.msra.gmra.mxu3 %vm478_vm1, %v467_v25 }
  0xa0   :  { %601 = vmatmul.msk.f32.vlgmr.msra.gmra.mxu0 %vm478_vm1, %v467_v25  ;;  %602 = vmatmul.msk.f32.vlgmr.msra.gmra.mxu1 %vm478_vm1, %v467_v25 }
 0x11d   :  { %v499_v26 = vpop.f32.mrf.mxu0  ;;  %v519_v27 = vpop.f32.mrf.mxu1 }
 0x11e   :  { %522 = vst [vmem:[%s757_s5] sm:$0xff] %v499_v26 }
 0x11f   :  { %523 = vst [vmem:[%s757_s5 + $0x8] sm:$0xff] %v519_v27 }
 0x122   :  { %v552_v28 = vpop.f32.mrf.mxu2  ;;  %v572_v29 = vpop.f32.mrf.mxu3 }
 0x123   :  { %605 = vst [vmem:[%s757_s5 + $0x10] sm:$0xff] %v552_v28 }
 0x124   :  { %606 = vst [vmem:[%s757_s5 + $0x18] sm:$0xff] %v572_v29 }

</bundles_post_ra>
